<compile_context>
chip_gen: v6e
topology: v6e:2x2x1
jax: 0.10.0
libtpu: 0.0.40
codegen_flags: <defaults>
</compile_context>

<pallas_src>
import functools

import jax
import jax.numpy as jnp
from jax import lax
from jax.experimental import pallas as pl
from jax.experimental.pallas import tpu as pltpu


_DMA_BUDGET_BYTES = 16 << 20     # double-buffered input block budget (2-pass)
_FUSED_BUDGET_BYTES = 30 << 20   # fused per-batch working-set gate (v7x-safe)
_SUB_BUDGET_BISECT = 32 * 1024   # (C, t_sub) f32 elems live in the bisect loop
_SUB_BUDGET_EXTRACT = 16 * 1024  # vals + cidx both live in the extraction loop


def _largest_tile(hwp, unit, fits):
    """Largest multiple of `unit` dividing `hwp` for which fits(t) is True."""
    assert hwp % unit == 0
    m = hwp // unit
    best = unit
    for d in range(1, m + 1):
        if m % d == 0 and fits(unit * d):
            best = unit * d
    return best


def _compiler_params(semantics, needed_bytes):
    # Explicit scoped-VMEM budget: enough for our blocks + headroom, but well
    # under v7x's 64 MiB physical VMEM (v5e scoped default is only 16 MiB).
    limit = int(min(max(needed_bytes + (12 << 20), 24 << 20), 48 << 20))
    return pltpu.CompilerParams(dimension_semantics=semantics,
                                vmem_limit_bytes=limit)


def _topk_mean(fw, k, use_bisect, n_bisect):
    """Mean of the k largest values of fw (C, T) f32 along axis 0, per lane."""
    C, T = fw.shape
    if not use_bisect:
        # Exact iterative extraction (small k): each step removes exactly one
        # maximal element per column via an int32 smallest-index tie-break.
        cidx = lax.broadcasted_iota(jnp.int32, (C, T), 0)

        def body(_, carry):
            acc, vals = carry
            m = jnp.max(vals, axis=0, keepdims=True)                    # (1,T)
            sel = jnp.min(jnp.where(vals == m, cidx, C),
                          axis=0, keepdims=True)
            return acc + m, jnp.where(cidx == sel, -jnp.inf, vals)

        acc, _ = lax.fori_loop(0, k, body,
                               (jnp.zeros((1, T), jnp.float32), fw),
                               unroll=True)
        topk_sum = acc
    else:
        # Large k: per-column bisection for the k-th largest value (cost is
        # O(n_bisect * C * T), independent of k), then the exact identity
        #   sum_topk = k*t + sum(relu(fw - t))   for t in [x_(k+1), x_(k)].
        kf = float(k)

        def body(_, carry):
            lo, hi = carry
            mid = 0.5 * (lo + hi)
            cnt = jnp.sum(jnp.where(fw >= mid, 1.0, 0.0),
                          axis=0, keepdims=True)
            ge_k = cnt >= kf
            return jnp.where(ge_k, mid, lo), jnp.where(ge_k, hi, mid)

        lo, _ = lax.fori_loop(0, n_bisect, body,
                              (jnp.min(fw, axis=0, keepdims=True),
                               jnp.max(fw, axis=0, keepdims=True)),
                              unroll=True)
        topk_sum = kf * lo + jnp.sum(jnp.maximum(fw - lo, 0.0),
                                     axis=0, keepdims=True)
    return topk_sum * (1.0 / k)


def _ptap_fused_kernel(band_ref, x_ref, o_ref, *, k, hw, use_bisect,
                       n_bisect, t_sub):
    """Single pass per batch over a VMEM-resident (C, HWp) slab."""
    c = x_ref.shape[1]
    hwp = x_ref.shape[2]

    # Pass 1: per-channel spatial sums, lane-dense (C, 128) accumulation (VPU
    # adds only; one XLU lane-reduce at the end).  128-lane granularity keeps
    # per-iteration liveness to two (C, 128) tiles regardless of slab size.
    def pool_body(j, acc):
        st = pl.multiple_of(j * 128, 128)
        return acc + x_ref[0, :, pl.ds(st, 128)].astype(jnp.float32)

    acc = lax.fori_loop(0, hwp // 128, pool_body,
                        jnp.zeros((c, 128), jnp.float32))
    y = jnp.sum(acc, axis=1, keepdims=True) * (1.0 / hw)        # (C, 1) means

    # ECA: 3-tap zero-padded conv along channels == tridiagonal band matmul
    # (band built in the wrapper).  RHS is lane-broadcast to keep the MXU
    # operand lane-dense; all lanes compute the same (C, 1) result.
    y128 = jnp.broadcast_to(y, (c, 128))
    zw = jnp.dot(band_ref[...], y128, preferred_element_type=jnp.float32)
    z = zw[:, 0:1]                                              # (C, 1)
    s = jax.nn.sigmoid(z)                                       # (C, 1) scale

    # Pass 2: scale + top-k channel mean, walking the resident slab in
    # vreg-budget-sized sub-tiles (DMA block size decoupled from vreg tile).
    @pl.loop(0, hwp // t_sub)
    def _(j):
        st = pl.multiple_of(j * t_sub, t_sub)
        fw = x_ref[0, :, pl.ds(st, t_sub)].astype(jnp.float32) * s
        o_ref[0, :, pl.ds(st, t_sub)] = _topk_mean(fw, k, use_bisect, n_bisect)


def _pool_kernel(x_ref, o_ref):
    """Two-pass fallback, pass A: per-channel partial sums, accumulated into a
    lane-dense (C, 128) output block resident across the 'arbitrary' HW axis."""
    @pl.when(pl.program_id(1) == 0)
    def _init():
        o_ref[...] = jnp.zeros_like(o_ref)

    c = x_ref.shape[1]
    t_a = x_ref.shape[2]

    def body(g, acc):
        st = pl.multiple_of(g * 128, 128)
        return acc + x_ref[0, :, pl.ds(st, 128)].astype(jnp.float32)

    acc = lax.fori_loop(0, t_a // 128, body, jnp.zeros((c, 128), jnp.float32))
    o_ref[0] = o_ref[0] + acc


def _scale_topk_kernel(s_ref, x_ref, o_ref, *, k, use_bisect, n_bisect, t_sub):
    """Two-pass fallback, pass B: apply the per-channel ECA scale and reduce to
    the mean of the top-k channels; large DMA block, small in-register tiles."""
    s = s_ref[0]                                               # (C, 1) f32
    t_dma = x_ref.shape[2]

    @pl.loop(0, t_dma // t_sub)
    def _(j):
        st = pl.multiple_of(j * t_sub, t_sub)
        fw = x_ref[0, :, pl.ds(st, t_sub)].astype(jnp.float32) * s
        o_ref[0, :, pl.ds(st, t_sub)] = _topk_mean(fw, k, use_bisect, n_bisect)


def ptap_forward(x, conv_w, *, n_bisect=24, small_k_threshold=10,
                 force_two_pass=False):
    """x: (B, C, H, W) NCHW (f32 or bf16); conv_w: (3,) ECA Conv1d weight."""
    B, C, H, W = x.shape
    k = int(C * 0.5)
    if k < 1:
        raise ValueError(f"PTAP needs channel_size >= 2 (C={C} gives k={k}).")
    HW = H * W
    in_dtype = x.dtype
    in_bytes = jnp.dtype(in_dtype).itemsize
    conv_w = conv_w.reshape(3).astype(jnp.float32)

    # Keep lane-dense 128-multiple tiling even for odd spatial sizes: pad HW
    # (padded pixels produce discarded outputs; channel top-k is per-pixel).
    HWp = pl.cdiv(HW, 128) * 128
    x_flat = x.reshape(B, C, HW)            # native dtype; upcast in-kernel
    if HWp != HW:
        x_flat = jnp.pad(x_flat, ((0, 0), (0, 0), (0, HWp - HW)))

    use_bisect = k > small_k_threshold
    sub_budget = _SUB_BUDGET_BISECT if use_bisect else _SUB_BUDGET_EXTRACT
    t_sub = _largest_tile(HWp, 128, lambda t: C * t <= sub_budget)

    fused_need = 2 * C * HWp * in_bytes + 2 * HWp * 4 + 2 * C * C * 4
    if (not force_two_pass) and fused_need <= _FUSED_BUDGET_BYTES:
        # --- Fused single pass: x read from HBM exactly once per batch. ---
        ci = jnp.arange(C)
        band = (conv_w[0] * (ci[None, :] == ci[:, None] - 1)
                + conv_w[1] * (ci[None, :] == ci[:, None])
                + conv_w[2] * (ci[None, :] == ci[:, None] + 1)
                ).astype(jnp.float32)                        # (C, C) tridiag
        out = pl.pallas_call(
            functools.partial(_ptap_fused_kernel, k=k, hw=HW,
                              use_bisect=use_bisect, n_bisect=n_bisect,
                              t_sub=t_sub),
            out_shape=jax.ShapeDtypeStruct((B, 1, HWp), jnp.float32),
            grid_spec=pltpu.PrefetchScalarGridSpec(
                num_scalar_prefetch=0,
                grid=(B,),
                in_specs=[pl.BlockSpec((C, C), lambda b: (0, 0)),
                          pl.BlockSpec((1, C, HWp), lambda b: (b, 0, 0))],
                out_specs=pl.BlockSpec((1, 1, HWp), lambda b: (b, 0, 0)),
            ),
            compiler_params=_compiler_params(("parallel",), fused_need),
        )(band, x_flat)
    else:
        # --- Two-pass fallback (slab does not fit VMEM, or forced). ---
        # Kernel A: global average pool; DMA-bound, so its tile is bounded by
        # the VMEM double-buffer budget, not the top-k vreg budget.
        t_a = _largest_tile(HWp, 128,
                            lambda t: 2 * C * t * in_bytes <= _DMA_BUDGET_BYTES)
        pool_need = 2 * C * t_a * in_bytes + 2 * C * 128 * 4
        pooled = pl.pallas_call(
            _pool_kernel,
            out_shape=jax.ShapeDtypeStruct((B, C, 128), jnp.float32),
            grid_spec=pltpu.PrefetchScalarGridSpec(
                num_scalar_prefetch=0,
                grid=(B, HWp // t_a),
                in_specs=[pl.BlockSpec((1, C, t_a), lambda b, t: (b, 0, t))],
                out_specs=pl.BlockSpec((1, C, 128), lambda b, t: (b, 0, 0)),
            ),
            compiler_params=_compiler_params(("parallel", "arbitrary"),
                                             pool_need),
        )(x_flat)

        # Tiny (B, C) ECA conv + sigmoid in XLA.
        y = pooled.sum(axis=-1) * (1.0 / HW)                       # (B, C)
        yp = jnp.pad(y, ((0, 0), (1, 1)))
        z = (conv_w[0] * yp[:, :-2] + conv_w[1] * yp[:, 1:-1]
             + conv_w[2] * yp[:, 2:])
        s = jax.nn.sigmoid(z)[:, :, None].astype(jnp.float32)      # (B, C, 1)

        # Kernel B: large DMA block, vreg-sized inner sub-tiles.
        t_dma = _largest_tile(
            HWp, t_sub,
            lambda t: 2 * C * t * in_bytes + 2 * t * 4 <= _DMA_BUDGET_BYTES)
        topk_need = 2 * C * t_dma * in_bytes + 2 * t_dma * 4 + 2 * C * 4
        out = pl.pallas_call(
            functools.partial(_scale_topk_kernel, k=k, use_bisect=use_bisect,
                              n_bisect=n_bisect, t_sub=t_sub),
            out_shape=jax.ShapeDtypeStruct((B, 1, HWp), jnp.float32),
            grid_spec=pltpu.PrefetchScalarGridSpec(
                num_scalar_prefetch=0,
                grid=(B, HWp // t_dma),
                in_specs=[pl.BlockSpec((1, C, 1), lambda b, t: (b, 0, 0)),
                          pl.BlockSpec((1, C, t_dma), lambda b, t: (b, 0, t))],
                out_specs=pl.BlockSpec((1, 1, t_dma), lambda b, t: (b, 0, t)),
            ),
            compiler_params=_compiler_params(("parallel", "parallel"),
                                             topk_need),
        )(s, x_flat)

    return out[:, 0, :HW].reshape(B, H, W).astype(in_dtype)


def ptap_reference(x, conv_w):
    """Pure-JAX reference matching the PyTorch forward."""
    B, C, H, W = x.shape
    k = int(C * 0.5)
    conv_w = conv_w.reshape(3)
    y = x.astype(jnp.float32).mean(axis=(2, 3))                   # (B, C)
    yp = jnp.pad(y, ((0, 0), (1, 1)))
    z = conv_w[0] * yp[:, :-2] + conv_w[1] * yp[:, 1:-1] + conv_w[2] * yp[:, 2:]
    s = jax.nn.sigmoid(z)
    fw = x.astype(jnp.float32) * s[:, :, None, None]
    top = jnp.sort(fw, axis=1)[:, C - k:, :, :]                   # k largest
    return (top.sum(axis=1) / k).astype(x.dtype)


if __name__ == "__main__":
    key = jax.random.PRNGKey(0)
    kx1, kx2, kw = jax.random.split(key, 3)
    # Deterministic stand-in for nn.Conv1d(1, 1, 3, bias=False).weight.
    conv_w = jax.random.uniform(kw, (3,), dtype=jnp.float32,
                                minval=-0.5, maxval=0.5)

    # Case 1: small C -> exact iterative-extraction top-k (fused single pass).
    B, C, H, W = 2, 8, 16, 16
    x1 = jax.random.normal(kx1, (B, C, H, W), dtype=jnp.float32)
    ref1 = jax.block_until_ready(ptap_reference(x1, conv_w))
    out1 = jax.block_until_ready(ptap_forward(x1, conv_w))
    assert out1.shape == (B, H, W)
    assert jnp.allclose(out1, ref1, rtol=1e-4, atol=1e-4), (
        f"case1 fused max abs err {jnp.max(jnp.abs(out1 - ref1))}")
    out1b = jax.block_until_ready(ptap_forward(x1, conv_w, force_two_pass=True))
    assert jnp.allclose(out1b, ref1, rtol=1e-4, atol=1e-4), (
        f"case1 two-pass max abs err {jnp.max(jnp.abs(out1b - ref1))}")

    # Case 2: larger C -> bisection top-k; multi-sub-tile walk (t_sub=512).
    B2, C2, H2, W2 = 2, 64, 64, 64
    x2 = jax.random.normal(kx2, (B2, C2, H2, W2), dtype=jnp.float32)
    ref2 = jax.block_until_ready(ptap_reference(x2, conv_w))
    out2 = jax.block_until_ready(ptap_forward(x2, conv_w))
    assert out2.shape == (B2, H2, W2)
    assert jnp.allclose(out2, ref2, rtol=1e-4, atol=1e-4), (
        f"case2 fused max abs err {jnp.max(jnp.abs(out2 - ref2))}")
    out2b = jax.block_until_ready(ptap_forward(x2, conv_w, force_two_pass=True))
    assert jnp.allclose(out2b, ref2, rtol=1e-4, atol=1e-4), (
        f"case2 two-pass max abs err {jnp.max(jnp.abs(out2b - ref2))}")

    print("KERNEL_OK")
</pallas_src>

<mosaic_0001>
module attributes {stable_mosaic.version = 11 : i64} {
  func.func @_ptap_fused_kernel(%arg0: i32, %arg1: memref<8x8xf32, #tpu.memory_space<vmem>>, %arg2: memref<1x8x256xf32, #tpu.memory_space<vmem>>, %arg3: memref<1x1x256xf32, #tpu.memory_space<vmem>>) attributes {dimension_semantics = [#tpu.dimension_semantics<parallel>], iteration_bounds = array<i64: 2>, scalar_prefetch = 0 : i64, scratch_operands = 0 : i64, tpu.core_type = #tpu.core_type<tc>, window_params = [{pipeline_mode = #tpu.pipeline_mode<synchronous>, transform_indices = @transform_0, window_bounds = array<i64: 8, 8>}, {transform_indices = @transform_1, window_bounds = array<i64: 1, 8, 256>}, {transform_indices = @transform_2, window_bounds = array<i64: 1, 1, 256>}]} {
    %cst = arith.constant 0.000000e+00 : f32
    %0 = vector.broadcast %cst : f32 to vector<8x128xf32>
    %c0_i32 = arith.constant 0 : i32
    %c2_i32 = arith.constant 2 : i32
    %1 = arith.addi %c0_i32, %c2_i32 : i32
    %c1_i32 = arith.constant 1 : i32
    %2 = scf.for %arg4 = %c0_i32 to %1 step %c1_i32 iter_args(%arg5 = %0) -> (vector<8x128xf32>)  : i32 {
      %c128_i32 = arith.constant 128 : i32
      %86 = arith.muli %arg4, %c128_i32 : i32
      %87 = tpu.assume_multiple %86, 128 : i32
      %c0_34 = arith.constant 0 : index
      %c0_35 = arith.constant 0 : index
      %88 = arith.index_cast %87 : i32 to index
      %89 = vector.load %arg2[%c0_34, %c0_35, %88] : memref<1x8x256xf32, #tpu.memory_space<vmem>>, vector<1x8x128xf32>
      %90 = vector.shape_cast %89 : vector<1x8x128xf32> to vector<8x128xf32>
      %91 = arith.addf %arg5, %90 : vector<8x128xf32>
      scf.yield %91 : vector<8x128xf32>
    }
    %c2_i32_0 = arith.constant 2 : i32
    %cst_1 = arith.constant dense<0.000000e+00> : vector<8xf32>
    %3 = vector.multi_reduction <add>, %2, %cst_1 [1] : vector<8x128xf32> to vector<8xf32>
    %4 = vector.shape_cast %3 : vector<8xf32> to vector<8x1xf32>
    %cst_2 = arith.constant 3.906250e-03 : f32
    %5 = vector.broadcast %cst_2 : f32 to vector<8x1xf32>
    %6 = arith.mulf %4, %5 : vector<8x1xf32>
    %7 = vector.shape_cast %6 : vector<8x1xf32> to vector<8x1xf32>
    %8 = vector.broadcast %7 : vector<8x1xf32> to vector<8x128xf32>
    %c0 = arith.constant 0 : index
    %c0_3 = arith.constant 0 : index
    %9 = vector.load %arg1[%c0, %c0_3] : memref<8x8xf32, #tpu.memory_space<vmem>>, vector<8x8xf32>
    %cst_4 = arith.constant dense<0.000000e+00> : vector<8x128xf32>
    %10 = tpu.matmul %9, %8, %cst_4 {dimension_numbers = #tpu.dot_dimension_numbers<[1], [0], [0], [1], [0, 0, 1, 1], [], []>} : vector<8x8xf32>, vector<8x128xf32>, vector<8x128xf32> -> vector<8x128xf32>
    %11 = vector.extract_strided_slice %10 {offsets = [0, 0], sizes = [8, 1], strides = [1, 1]} : vector<8x128xf32> to vector<8x1xf32>
    %12 = arith.negf %11 : vector<8x1xf32>
    %13 = math.exp %12 : vector<8x1xf32>
    %cst_5 = arith.constant 1.000000e+00 : f32
    %14 = vector.broadcast %cst_5 : f32 to vector<8x1xf32>
    %15 = arith.addf %14, %13 : vector<8x1xf32>
    %16 = arith.divf %14, %15 : vector<8x1xf32>
    %c0_i32_6 = arith.constant 0 : i32
    %c1_i32_7 = arith.constant 1 : i32
    %17 = arith.muli %c0_i32_6, %c1_i32_7 : i32
    %c0_i32_8 = arith.constant 0 : i32
    %18 = arith.addi %c0_i32_8, %17 : i32
    %c256_i32 = arith.constant 256 : i32
    %19 = arith.muli %18, %c256_i32 : i32
    %20 = tpu.assume_multiple %19, 256 : i32
    %c0_9 = arith.constant 0 : index
    %c0_10 = arith.constant 0 : index
    %21 = arith.index_cast %20 : i32 to index
    %22 = vector.load %arg2[%c0_9, %c0_10, %21] : memref<1x8x256xf32, #tpu.memory_space<vmem>>, vector<1x8x256xf32>
    %23 = vector.shape_cast %22 : vector<1x8x256xf32> to vector<8x256xf32>
    %24 = vector.broadcast %16 : vector<8x1xf32> to vector<8x256xf32>
    %25 = arith.mulf %23, %24 : vector<8x256xf32>
    %26 = tpu.iota {dimensions = array<i32: 0>} : vector<8x256xi32>
    %cst_11 = arith.constant 0.000000e+00 : f32
    %27 = vector.broadcast %cst_11 : f32 to vector<1x256xf32>
    %c0_i32_12 = arith.constant 0 : i32
    %cst_13 = arith.constant dense<0xFF800000> : vector<256xf32>
    %28 = vector.multi_reduction <maximumf>, %25, %cst_13 [0] : vector<8x256xf32> to vector<256xf32>
    %29 = vector.shape_cast %28 : vector<256xf32> to vector<1x256xf32>
    %30 = vector.broadcast %29 : vector<1x256xf32> to vector<8x256xf32>
    %31 = arith.cmpf oeq, %25, %30 : vector<8x256xf32>
    %c8_i32 = arith.constant 8 : i32
    %32 = vector.broadcast %c8_i32 : i32 to vector<8x256xi32>
    %33 = arith.select %31, %26, %32 : vector<8x256xi1>, vector<8x256xi32>
    %cst_14 = arith.constant dense<2147483647> : vector<256xi32>
    %34 = vector.multi_reduction <minsi>, %33, %cst_14 [0] : vector<8x256xi32> to vector<256xi32>
    %35 = vector.shape_cast %34 : vector<256xi32> to vector<1x256xi32>
    %36 = arith.addf %27, %29 : vector<1x256xf32>
    %37 = vector.broadcast %35 : vector<1x256xi32> to vector<8x256xi32>
    %38 = arith.cmpi eq, %26, %37 : vector<8x256xi32>
    %cst_15 = arith.constant 0xFF800000 : f32
    %39 = vector.broadcast %cst_15 : f32 to vector<8x256xf32>
    %40 = arith.select %38, %39, %25 : vector<8x256xi1>, vector<8x256xf32>
    %c1_i32_16 = arith.constant 1 : i32
    %cst_17 = arith.constant dense<0xFF800000> : vector<256xf32>
    %41 = vector.multi_reduction <maximumf>, %40, %cst_17 [0] : vector<8x256xf32> to vector<256xf32>
    %42 = vector.shape_cast %41 : vector<256xf32> to vector<1x256xf32>
    %43 = vector.broadcast %42 : vector<1x256xf32> to vector<8x256xf32>
    %44 = arith.cmpf oeq, %40, %43 : vector<8x256xf32>
    %c8_i32_18 = arith.constant 8 : i32
    %45 = vector.broadcast %c8_i32_18 : i32 to vector<8x256xi32>
    %46 = arith.select %44, %26, %45 : vector<8x256xi1>, vector<8x256xi32>
    %cst_19 = arith.constant dense<2147483647> : vector<256xi32>
    %47 = vector.multi_reduction <minsi>, %46, %cst_19 [0] : vector<8x256xi32> to vector<256xi32>
    %48 = vector.shape_cast %47 : vector<256xi32> to vector<1x256xi32>
    %49 = arith.addf %36, %42 : vector<1x256xf32>
    %50 = vector.broadcast %48 : vector<1x256xi32> to vector<8x256xi32>
    %51 = arith.cmpi eq, %26, %50 : vector<8x256xi32>
    %cst_20 = arith.constant 0xFF800000 : f32
    %52 = vector.broadcast %cst_20 : f32 to vector<8x256xf32>
    %53 = arith.select %51, %52, %40 : vector<8x256xi1>, vector<8x256xf32>
    %c2_i32_21 = arith.constant 2 : i32
    %cst_22 = arith.constant dense<0xFF800000> : vector<256xf32>
    %54 = vector.multi_reduction <maximumf>, %53, %cst_22 [0] : vector<8x256xf32> to vector<256xf32>
    %55 = vector.shape_cast %54 : vector<256xf32> to vector<1x256xf32>
    %56 = vector.broadcast %55 : vector<1x256xf32> to vector<8x256xf32>
    %57 = arith.cmpf oeq, %53, %56 : vector<8x256xf32>
    %c8_i32_23 = arith.constant 8 : i32
    %58 = vector.broadcast %c8_i32_23 : i32 to vector<8x256xi32>
    %59 = arith.select %57, %26, %58 : vector<8x256xi1>, vector<8x256xi32>
    %cst_24 = arith.constant dense<2147483647> : vector<256xi32>
    %60 = vector.multi_reduction <minsi>, %59, %cst_24 [0] : vector<8x256xi32> to vector<256xi32>
    %61 = vector.shape_cast %60 : vector<256xi32> to vector<1x256xi32>
    %62 = arith.addf %49, %55 : vector<1x256xf32>
    %63 = vector.broadcast %61 : vector<1x256xi32> to vector<8x256xi32>
    %64 = arith.cmpi eq, %26, %63 : vector<8x256xi32>
    %cst_25 = arith.constant 0xFF800000 : f32
    %65 = vector.broadcast %cst_25 : f32 to vector<8x256xf32>
    %66 = arith.select %64, %65, %53 : vector<8x256xi1>, vector<8x256xf32>
    %c3_i32 = arith.constant 3 : i32
    %cst_26 = arith.constant dense<0xFF800000> : vector<256xf32>
    %67 = vector.multi_reduction <maximumf>, %66, %cst_26 [0] : vector<8x256xf32> to vector<256xf32>
    %68 = vector.shape_cast %67 : vector<256xf32> to vector<1x256xf32>
    %69 = vector.broadcast %68 : vector<1x256xf32> to vector<8x256xf32>
    %70 = arith.cmpf oeq, %66, %69 : vector<8x256xf32>
    %c8_i32_27 = arith.constant 8 : i32
    %71 = vector.broadcast %c8_i32_27 : i32 to vector<8x256xi32>
    %72 = arith.select %70, %26, %71 : vector<8x256xi1>, vector<8x256xi32>
    %cst_28 = arith.constant dense<2147483647> : vector<256xi32>
    %73 = vector.multi_reduction <minsi>, %72, %cst_28 [0] : vector<8x256xi32> to vector<256xi32>
    %74 = vector.shape_cast %73 : vector<256xi32> to vector<1x256xi32>
    %75 = arith.addf %62, %68 : vector<1x256xf32>
    %76 = vector.broadcast %74 : vector<1x256xi32> to vector<8x256xi32>
    %77 = arith.cmpi eq, %26, %76 : vector<8x256xi32>
    %cst_29 = arith.constant 0xFF800000 : f32
    %78 = vector.broadcast %cst_29 : f32 to vector<8x256xf32>
    %79 = arith.select %77, %78, %66 : vector<8x256xi1>, vector<8x256xf32>
    %cst_30 = arith.constant 2.500000e-01 : f32
    %80 = vector.broadcast %cst_30 : f32 to vector<1x256xf32>
    %81 = arith.mulf %75, %80 : vector<1x256xf32>
    %c0_31 = arith.constant 0 : index
    %c0_32 = arith.constant 0 : index
    %82 = arith.index_cast %20 : i32 to index
    %83 = vector.load %arg3[%c0_31, %c0_32, %82] : memref<1x1x256xf32, #tpu.memory_space<vmem>>, vector<1x1x256xf32>
    %84 = vector.shape_cast %83 : vector<1x1x256xf32> to vector<1x256xf32>
    %85 = vector.shape_cast %81 : vector<1x256xf32> to vector<1x1x256xf32>
    tpu.vector_store %arg3[%c0_31, %c0_32, %82], %85 {strides = array<i32>} : memref<1x1x256xf32, #tpu.memory_space<vmem>>, vector<1x1x256xf32>,
    %c1_i32_33 = arith.constant 1 : i32
    return
  }
  func.func @transform_0(%arg0: i32) -> (i32, i32) {
    %c0_i32 = arith.constant 0 : i32
    %c0_i32_0 = arith.constant 0 : i32
    %c0_i32_1 = arith.constant 0 : i32
    return %c0_i32, %c0_i32_0 : i32, i32
  }
  func.func @transform_1(%arg0: i32) -> (i32, i32, i32) {
    %c0_i32 = arith.constant 0 : i32
    %c0_i32_0 = arith.constant 0 : i32
    %c0_i32_1 = arith.constant 0 : i32
    return %arg0, %c0_i32, %c0_i32_0 : i32, i32, i32
  }
  func.func @transform_2(%arg0: i32) -> (i32, i32, i32) {
    %c0_i32 = arith.constant 0 : i32
    %c0_i32_0 = arith.constant 0 : i32
    %c0_i32_1 = arith.constant 0 : i32
    return %arg0, %c0_i32, %c0_i32_0 : i32, i32, i32
  }
}

</mosaic_0001>

<bundles_post_ra>
// kernel: tpu_custom_call.1
= control target key start
LH: loop header
LB: loop body
LE: loop exit
PB: predicated region body
PF: predicated region fallthrough
CT: control target
= control target key end

     0   :  { %7 = vsyncpa [#allocation3], 0  ;;  %s1030_s0 = inlined_call_operand.hbm [shape: f32[8,8], index: 0, kind: input, shape index: {}]   ;;  %s1031_s1 = inlined_call_operand.hbm [shape: f32[2,8,256], index: 1, kind: input, shape index: {}]   ;;  %s1032_s2 = inlined_call_operand.hbm [shape: f32[2,1,256], index: 2, kind: output, shape index: {}]  }
   0x1   :  { %8 = vsyncpa [#allocation6], 0 }
   0x2   :  { %10 = vsyncpa [#allocation6 + $0x1], 0 }
   0x3   :  { %11 = vsyncpa [#allocation4], 0 }
   0x4   :  { %13 = vsyncpa [#allocation4 + $0x1], 0  ;;  %s821_s9 = smov 0   ;;  %s823_s10 = smov 0  }
   0x5   :  { %s825_s11 = smov 0   ;;  %s827_s12 = smov 0  }
   0x6 LB: > { %s842_s13 = sadd.s32 4294967295, %s789_s12   ;;  %s548_s14 = sadd.s32 4294967294, %s789_s12   ;;  %s789_s12 = sphi %s827_s12, %s1055_s12   ;;  %s785_s11 = sphi %s825_s11, %s1054_s11   ;;  %s781_s10 = sphi %s823_s10, %s1053_s10   ;;  %s777_s9 = sphi %s821_s9, %s1052_s9  }
   0x7   : > { %p60_p0 = scmp.ne.s32.totalorder %s781_s10, %s777_s9  ;;  %p1033_p1 = scmp.eq.s32.totalorder %s842_s13, 0 }
   0x8   : > { %p90_p3 = scmp.eq.s32.totalorder %s548_s14, 1  ;;  %p549_p5 = scmp.ge.s32.totalorder %s789_s12, 1 }
   0x9   : > { %p851_p4 = por %p1033_p1, %p60_p0  ;;  %p97_p7 = scmp.lt.s32.totalorder %s789_s12, 3 }
   0xa   : > { %p856_p6 = por %p90_p3, %p60_p0  ;;  %s799_s18 = smov [#allocation2]  }
   0xb   : > { %s1037_s15 = scalar_select %p851_p4, 1, 0 }
   0xc   : > { %s1038_s16 = scalar_select %p856_p6, 1, 0 }
   0xd   : > { %p861_p8 = pnand %p549_p5, %p97_p7  ;;  %s110_s19 = sshll.u32 %s799_s18, 4  ;;  %s111_s19 = int_to_ptr.vmem [resolvable:$true] %s110_s19 }
   0xe   : > { %s869_s20 = sadd.s32 1, %s789_s12   ;;  %s47_s24 = sadd.s32 1, %s785_s11 }
   0xf   : > { %s1039_s17 = scalar_select %p861_p8, 1, 0 }
  0x10   : > { %p585_p10 = pneg %p861_p8  ;;  %s44_s22 = ssub.s32 %s789_s12, %s869_s20 }
  0x11   : > { %p879_p12 = scmp.eq.s32.totalorder %s44_s22, 0  ;;  %p54_p13 = scmp.ne.s32.totalorder %s785_s11, %s781_s10 }
  0x12   : > { %p873_p11 = pnand %p585_p10, %p1033_p1  ;;  %s670_s25 = scalar_lea.vmem %s111_s19, 128 }
  0x13   : > { %p671_p3 = scmp.ne.s32.totalorder %s111_s19, %s670_s25  ;;  %p678_p9 = scmp.lt.s32.totalorder %s111_s19, %s111_s19 }
  0x14   : > { %p661_p0 = pneg %p873_p11  ;;  %p679_p2 = scmp.lt.s32.totalorder %s670_s25, %s670_s25 }
  0x16   : > { %p673_p5 = pnand %p671_p3, %p661_p0  ;;  %p680_p10 = por %p679_p2, %p678_p9 }
  0x18   : > { %p674_p7 = pneg %p673_p5 }
  0x1a   : > { %p681_p1 = pnand %p680_p10, %p674_p7 }
  0x1c   : > { %684 = shalt.err (!%p681_p1)
}
  0x1d   : > { %588 = dma.hbm_to_vmem [thread:$0]  (!%p873_p11), %s1030_s0, 128, %s111_s19, [#allocation3]  }
  0x1e   : > { %s896_s28 = scalar_select %p879_p12, %s785_s11, %s47_s24  }
  0x1f   : > { %p55_p1 = scmp.eq.s32.totalorder %s789_s12, 0  ;;  %p1042_p2 = scmp.eq.s32.totalorder %s842_s13, 1 }
  0x20   : > { %p598_p0 = scmp.lt.s32.totalorder %s789_s12, 2  ;;  %s121_s30 = sand.u32 1, %s785_s11  }
  0x21   : > { %p904_p9 = por %p1042_p2, %p54_p13  ;;  %p56_p3 = por %p55_p1, %p54_p13 }
  0x22   : > { %s552_s3 = sshll.u32 %s121_s30, 4  ;;  %s568_s4 = sshll.u32 %s789_s12, 8 }
  0x23   : > { %s1043_s29 = scalar_select %p904_p9, 1, 0 }
  0x24   : > { %s917_s7 = scalar_lea.hbm %s1031_s1, %s568_s4  ;;  %s125_s8 = scalar_lea.vmem [#allocation5], %s552_s3 }
  0x25   : > { %s133_s14 = sshll.u32 %s125_s8, 4  ;;  %p919_p11 = pnand %p598_p0, %p56_p3  ;;  %s134_s14 = int_to_ptr.vmem [resolvable:$true] %s133_s14 }
  0x26   : > { %s122_s19 = scalar_lea.sflag [#allocation6], %s121_s30  ;;  %s685_s21 = scalar_lea.hbm %s917_s7, 256 }
  0x27   : > { %p686_p12 = scmp.ne.s32.totalorder %s917_s7, %s685_s21  ;;  %p687_p13 = pneg %p919_p11 }
  0x28   : > { %s690_s24 = scalar_lea.hbm %s1031_s1, 512  ;;  %p691_p10 = scmp.lt.s32.totalorder %s917_s7, %s1031_s1 }
  0x29   : > { %p688_p5 = pnand %p687_p13, %p686_p12  ;;  %p692_p1 = scmp.lt.s32.totalorder %s690_s24, %s685_s21 }
  0x2b   : > { %p689_p7 = pneg %p688_p5  ;;  %p693_p2 = por %p692_p1, %p691_p10 }
  0x2d   : > { %p694_p0 = pnand %p693_p2, %p689_p7 }
  0x2f   : > { %697 = shalt.err (!%p694_p0)
}
  0x30   : > { %s698_s27 = scalar_lea.vmem %s134_s14, 256  ;;  %s800_s30 = smov [#allocation5]  }
  0x31   : > { %p699_p3 = scmp.ne.s32.totalorder %s134_s14, %s698_s27  ;;  %s703_s3 = sshll.u32 %s800_s30, 4  ;;  %s704_s3 = int_to_ptr.vmem [resolvable:$false] %s703_s3 }
  0x32   : > { %s705_s4 = scalar_lea.vmem %s704_s3, 512  ;;  %p706_p12 = scmp.lt.s32.totalorder %s134_s14, %s704_s3 }
  0x33   : > { %p701_p6 = pnand %p699_p3, %p687_p13  ;;  %p707_p5 = scmp.lt.s32.totalorder %s705_s4, %s698_s27 }
  0x35   : > { %p702_p9 = pneg %p701_p6  ;;  %p708_p4 = por %p707_p5, %p706_p12 }
  0x37   : > { %p709_p8 = pnand %p708_p4, %p702_p9 }
  0x39   : > { %712 = shalt.err (!%p709_p8)
}
  0x3a   : > { %592 = dma.hbm_to_vmem [thread:$0]  (!%p919_p11), %s917_s7, 256, %s134_s14, %s122_s19  }
  0x3b   : > { %p1045_p7 = scmp.ne.s32.totalorder %s1039_s17, 0 }
  0x3c   : > { %p1046_p10 = scmp.eq.s32.totalorder (!%p1045_p7), %s842_s13, 0 }
  0x3d   : > { %142 = sbr.rel (%p1045_p7) target bundleno = 691 (0x2b3), region = 28 }
  0x42   : > { %764 = dma.done.wait (%p1046_p10), [#allocation3], 128   ;;  %p1047_p6 = pmov %p1046_p10 }
  0x43   : > { %s944_s5 = sand.u32 1, %s781_s10   ;;  %p1048_p4 = scmp.ne.s32.totalorder %s1037_s15, 0 }
  0x44   : > { %766 = vsyncadd (%p1047_p6), [#allocation3], 4294967168  ;;  %s557_s6 = sshll.u32 %s944_s5, 4  ;;  %s149_s8 = scalar_lea.sflag [#allocation6], %s944_s5 }
  0x45   : > { %s948_s18 = scalar_lea.vmem [#allocation5], %s557_s6 }
  0x46   : > { %768 = dma.done.wait (%p1048_p4), %s149_s8, 256  }
  0x47   : > { %770 = vsyncadd (%p1048_p4), %s149_s8, 4294967040  ;;  %s558_s17 = sshll.u32 %s944_s5, 1  ;;  %v791_v0 = vmov 0.0   ;;  %s795_s14 = smov 0  }
  0x48   : > { %s955_s7 = scalar_lea.vmem [#allocation7], %s558_s17 }
  0x49 LB: >> { %s559_s19 = sshll.u32 %s797_s14, 7  ;;  %s178_s14 = sadd.s32 1, %s797_s14   ;;  %s797_s14 = sphi %s795_s14, %s178_s14   ;;  %v793_v0 = vphi %v791_v0, %v792_v0  }
  0x4a   : >> { %s181_s21 = sshra.s32 %s559_s19, 7  ;;  %p175_p8 = scmp.ge.s32.totalorder %s178_s14, 2  }
  0x4b   : >> { %s560_s22 = sshll.u32 %s181_s21, 3  ;;  %v801_v3 = vmov (%p175_p8), 0.0   ;;  %vm802_vm0 = vmmov (%p175_p8), 0   ;;  %v190_v6 = vld [vmem:[#allocation2] sm:$0xff] (%p175_p8)  ;;  %vm191_vm1 = vcmask (%p175_p8), 64512   ;;  %v803_v7 = vmov (%p175_p8), 0  }
  0x4c   : >> { %s184_s23 = scalar_lea.vmem %s948_s18, %s560_s22 [#allocation5]  ;;  %177 = sbr.rel (!%p175_p8) target bundleno = 73 (0x49), region = 86  ;;  %572 = vmatprep.subr.mxu0 (%p175_p8), %v801_v3  ;;  %574 = vmatprep.mubr.msk.f32.mxu0 (%p175_p8), %vm802_vm0, %v801_v3  ;;  %v271_v14 = vld [vmem:[%s948_s18] sm:$0xff] (%p175_p8)  ;;  %v272_v15 = vld [vmem:[%s948_s18 + $0x8] sm:$0xff] (%p175_p8)  ;;  %v280_v25 = vlaneseq (%p175_p8) }
  0x4d   : >> { %v185_v1 = vld [vmem:[%s184_s23] sm:$0xff]  ;;  %654 = vset.pattern.permute.xlu0 (%p175_p8), %v803_v7  ;;  %s569_s15 = sshll.u32 (%p175_p8), %s842_s13, 5  ;;  %s456_s24 = sshll.u32 (%p175_p8), %s955_s7, 4  ;;  %s457_s24 = int_to_ptr.vmem [resolvable:$true] %s456_s24 }
  0x4e   : >> { %v186_v2 = vadd.f32 %v793_v0, %v185_v1   ;;  %v961_v30 = vshrl.u32 (%p175_p8), %v280_v25, 7  ;;  %s454_s27 = scalar_lea.hbm (%p175_p8), %s1032_s2, %s569_s15  ;;  %s442_s30 = scalar_lea.sflag (%p175_p8), [#allocation4], %s944_s5 }
  0x4f   : > { %s713_s3 = scalar_lea.vmem (%p175_p8), %s457_s24, 32  ;;  %p1049_p11 = scmp.ne.s32.totalorder (%p175_p8), %s1043_s29, 0 }
  0x50   : >> { %v792_v0 = vmov %v186_v2   ;;  %187 = vadd.xlane.f32.xlu0 (%p175_p8), %v186_v2  ;;  %p714_p9 = scmp.ne.s32.totalorder (%p175_p8), %s457_s24, %s713_s3  ;;  %s805_s4 = smov (%p175_p8), [#allocation7]  }
  0x51   : > { %s717_s6 = sshll.u32 %s805_s4, 4  ;;  %s718_s6 = int_to_ptr.vmem [resolvable:$false] %s717_s6 }
  0x52   : > { %p715_p13 = pnand %p714_p9, %p1049_p11  ;;  %s719_s13 = scalar_lea.vmem %s718_s6, 64 }
  0x53   : > { %p720_p2 = scmp.lt.s32.totalorder %s457_s24, %s718_s6  ;;  %p721_p0 = scmp.lt.s32.totalorder %s719_s13, %s713_s3 }
  0x54   : > { %p716_p1 = pneg %p715_p13 }
  0x55   : > { %p722_p3 = por %p721_p0, %p720_p2 }
  0x57   : > { %p723_p12 = pnand %p722_p3, %p716_p1 }
  0xd9   : > { %v188_v4 = vpop.xlane.xlu0 %187 }
  0xda   : > { %v189_v5 = vmul.f32 0.00390625, %v188_v4 }
  0xdc   : > { %573 = vmatpush3.msra.mxu0 %v189_v5 }
  0xdd   : > { %575 = vmatmul.mubr.msk.f32.vlgmr.msra.gmra.mxu0 %vm191_vm1, %v190_v6 }
 0x19d   : > { %v261_v8 = vpop.f32.mrf.mxu0 }
 0x19e   : > { %v562_v9 = vmul.f32 -1.442695, %v261_v8 }
 0x19f   : > { %v576_v10 = vpop.f32.mrf.mxu0 }
 0x1a0   : > { %655 = vpow2.f32 %v562_v9 }
 0x1ad   : > { %v656_v11 = vpop.eup %655 }
 0x1ae   : > { %v268_v12 = vadd.f32 1.0, %v656_v11 }
 0x1b0   : > { %657 = vrcp.f32 %v268_v12 }
 0x1bd   : > { %v658_v13 = vpop.eup %657 }
 0x1be   : > { %275 = vperm.xlu0 %654, %v658_v13  }
 0x239   : > { %v276_v16 = vpop.permute.xlu0 %275 }
 0x23a   : > { %v278_v17 = vmul.f32 %v276_v16, %v271_v14  ;;  %v279_v18 = vmul.f32 %v276_v16, %v272_v15 }
 0x23c   : > { %v282_v19 = vrot.slane %v278_v17, 4  ;;  %v288_v20 = vrot.slane %v279_v18, 4 }
 0x23e   : > { %v283_v21 = vmax.f32 %v278_v17, %v282_v19  ;;  %v289_v22 = vmax.f32 %v279_v18, %v288_v20 }
 0x240   : > { %v284_v23 = vrot.slane %v283_v21, 2  ;;  %v290_v24 = vrot.slane %v289_v22, 2 }
 0x242   : > { %v285_v26 = vmax.f32 %v283_v21, %v284_v23  ;;  %v291_v27 = vmax.f32 %v289_v22, %v290_v24 }
 0x244   : > { %v286_v28 = vrot.slane %v285_v26, 1  ;;  %v292_v29 = vrot.slane %v291_v27, 1 }
 0x246   : > { %v963_v31 = vmax.f32 %v285_v26, %v286_v28  ;;  %v965_v32 = vmax.f32 %v291_v27, %v292_v29 }
 0x248   : > { %vm294_vm2 = vcmp.eq.f32.partialorder %v278_v17, %v963_v31  ;;  %vm295_vm3 = vcmp.eq.f32.partialorder %v279_v18, %v965_v32 }
 0x249   : > { %v296_v33 = vsel %vm294_vm2, %v961_v30, 8  ;;  %v297_v34 = vsel %vm295_vm3, %v961_v30, 8 }
 0x24a   : > { %v298_v35 = vrot.slane %v296_v33, 4  ;;  %v307_v36 = vrot.slane %v297_v34, 4 }
 0x24c   : > { %vm299_vm4 = vcmp.lt.s32.totalorder %v296_v33, %v298_v35  ;;  %vm308_vm5 = vcmp.lt.s32.totalorder %v297_v34, %v307_v36 }
 0x24d   : > { %v300_v37 = vsel %vm299_vm4, %v296_v33, %v298_v35  ;;  %v309_v38 = vsel %vm308_vm5, %v297_v34, %v307_v36 }
 0x24e   : > { %v301_v39 = vrot.slane %v300_v37, 2  ;;  %v310_v40 = vrot.slane %v309_v38, 2 }
 0x250   : > { %vm302_vm6 = vcmp.lt.s32.totalorder %v300_v37, %v301_v39  ;;  %vm311_vm7 = vcmp.lt.s32.totalorder %v309_v38, %v310_v40 }
 0x251   : > { %v303_v41 = vsel %vm302_vm6, %v300_v37, %v301_v39  ;;  %v312_v42 = vsel %vm311_vm7, %v309_v38, %v310_v40 }
 0x252   : > { %v304_v43 = vrot.slane %v303_v41, 1  ;;  %v313_v44 = vrot.slane %v312_v42, 1 }
 0x254   : > { %vm305_vm8 = vcmp.lt.s32.totalorder %v303_v41, %v304_v43  ;;  %vm314_vm9 = vcmp.lt.s32.totalorder %v312_v42, %v313_v44 }
 0x255   : > { %v306_v45 = vsel %vm305_vm8, %v303_v41, %v304_v43  ;;  %v315_v46 = vsel %vm314_vm9, %v312_v42, %v313_v44 }
 0x256   : > { %vm318_vm10 = vcmp.eq.s32.totalorder %v961_v30, %v306_v45  ;;  %vm319_vm11 = vcmp.eq.s32.totalorder %v961_v30, %v315_v46 }
 0x257   : > { %v320_v47 = vsel %vm318_vm10, -inf, %v278_v17  ;;  %v321_v48 = vsel %vm319_vm11, -inf, %v279_v18 }
 0x258   : > { %v322_v49 = vrot.slane %v320_v47, 4  ;;  %v328_v50 = vrot.slane %v321_v48, 4 }
 0x25a   : > { %v323_v51 = vmax.f32 %v320_v47, %v322_v49  ;;  %v329_v52 = vmax.f32 %v321_v48, %v328_v50 }
 0x25c   : > { %v324_v53 = vrot.slane %v323_v51, 2  ;;  %v330_v54 = vrot.slane %v329_v52, 2 }
 0x25e   : > { %v325_v55 = vmax.f32 %v323_v51, %v324_v53  ;;  %v331_v56 = vmax.f32 %v329_v52, %v330_v54  ;;  %v804_v51 = vmov 1966171168  }
 0x25f   : > { %v422_v52 = vunpack.c.l.s4 %v804_v51 }
 0x260   : > { %v326_v57 = vrot.slane %v325_v55, 1  ;;  %v332_v58 = vrot.slane %v331_v56, 1 }
 0x262   : > { %v973_v59 = vmax.f32 %v325_v55, %v326_v57  ;;  %v975_v60 = vmax.f32 %v331_v56, %v332_v58 }
 0x264   : > { %vm334_vm12 = vcmp.eq.f32.partialorder %v320_v47, %v973_v59  ;;  %vm335_vm13 = vcmp.eq.f32.partialorder %v321_v48, %v975_v60  ;;  %v356_v55 = vadd.f32 %v973_v59, %v963_v31  ;;  %v357_v56 = vadd.f32 %v975_v60, %v965_v32 }
 0x265   : > { %v336_v61 = vsel %vm334_vm12, %v961_v30, 8  ;;  %v337_v62 = vsel %vm335_vm13, %v961_v30, 8 }
 0x266   : > { %v338_v63 = vrot.slane %v336_v61, 4  ;;  %v347_v0 = vrot.slane %v337_v62, 4 }
 0x268   : > { %vm339_vm14 = vcmp.lt.s32.totalorder %v336_v61, %v338_v63  ;;  %vm348_vm15 = vcmp.lt.s32.totalorder %v337_v62, %v347_v0 }
 0x269   : > { %v340_v1 = vsel %vm339_vm14, %v336_v61, %v338_v63  ;;  %v349_v2 = vsel %vm348_vm15, %v337_v62, %v347_v0  ;;  %v423_v61 = vunpack.c.0.s8 %v422_v52 }
 0x26a   : > { %v341_v3 = vrot.slane %v340_v1, 2  ;;  %v350_v4 = vrot.slane %v349_v2, 2 }
 0x26b   : > { %v426_v31 = vsub.s32 %v423_v61, %v961_v30 }
 0x26c   : > { %vm342_vm0 = vcmp.lt.s32.totalorder %v340_v1, %v341_v3  ;;  %vm351_vm1 = vcmp.lt.s32.totalorder %v349_v2, %v350_v4 }
 0x26d   : > { %v343_v5 = vsel %vm342_vm0, %v340_v1, %v341_v3  ;;  %v352_v6 = vsel %vm351_vm1, %v349_v2, %v350_v4  ;;  %vm438_vm0 = vcmp.lt.s32.totalorder %v280_v25, 256 }
 0x26e   : > { %v344_v7 = vrot.slane %v343_v5, 1  ;;  %v353_v8 = vrot.slane %v352_v6, 1 }
 0x270   : > { %vm345_vm2 = vcmp.lt.s32.totalorder %v343_v5, %v344_v7  ;;  %vm354_vm3 = vcmp.lt.s32.totalorder %v352_v6, %v353_v8 }
 0x271   : > { %v346_v9 = vsel %vm345_vm2, %v343_v5, %v344_v7  ;;  %v355_v10 = vsel %vm354_vm3, %v352_v6, %v353_v8 }
 0x272   : > { %vm358_vm4 = vcmp.eq.s32.totalorder %v961_v30, %v346_v9  ;;  %vm359_vm5 = vcmp.eq.s32.totalorder %v961_v30, %v355_v10 }
 0x273   : > { %v360_v11 = vsel %vm358_vm4, -inf, %v320_v47  ;;  %v361_v12 = vsel %vm359_vm5, -inf, %v321_v48 }
 0x274   : > { %v362_v13 = vrot.slane %v360_v11, 4  ;;  %v368_v14 = vrot.slane %v361_v12, 4 }
 0x276   : > { %v363_v15 = vmax.f32 %v360_v11, %v362_v13  ;;  %v369_v16 = vmax.f32 %v361_v12, %v368_v14 }
 0x278   : > { %v364_v17 = vrot.slane %v363_v15, 2  ;;  %v370_v18 = vrot.slane %v369_v16, 2 }
 0x27a   : > { %v365_v19 = vmax.f32 %v363_v15, %v364_v17  ;;  %v371_v20 = vmax.f32 %v369_v16, %v370_v18 }
 0x27c   : > { %v366_v21 = vrot.slane %v365_v19, 1  ;;  %v372_v22 = vrot.slane %v371_v20, 1 }
 0x27e   : > { %v367_v23 = vmax.f32 %v365_v19, %v366_v21  ;;  %v373_v24 = vmax.f32 %v371_v20, %v372_v22 }
 0x280   : > { %vm374_vm6 = vcmp.eq.f32.partialorder %v360_v11, %v367_v23  ;;  %vm375_vm7 = vcmp.eq.f32.partialorder %v361_v12, %v373_v24  ;;  %v396_v62 = vadd.f32 %v367_v23, %v356_v55  ;;  %v397_v63 = vadd.f32 %v373_v24, %v357_v56 }
 0x281   : > { %v376_v26 = vsel %vm374_vm6, %v961_v30, 8  ;;  %v377_v27 = vsel %vm375_vm7, %v961_v30, 8 }
 0x282   : > { %v378_v28 = vrot.slane %v376_v26, 4  ;;  %v387_v29 = vrot.slane %v377_v27, 4 }
 0x284   : > { %vm379_vm8 = vcmp.lt.s32.totalorder %v376_v26, %v378_v28  ;;  %vm388_vm9 = vcmp.lt.s32.totalorder %v377_v27, %v387_v29 }
 0x285   : > { %v380_v33 = vsel %vm379_vm8, %v376_v26, %v378_v28  ;;  %v389_v34 = vsel %vm388_vm9, %v377_v27, %v387_v29 }
 0x286   : > { %v381_v35 = vrot.slane %v380_v33, 2  ;;  %v390_v36 = vrot.slane %v389_v34, 2 }
 0x288   : > { %vm382_vm10 = vcmp.lt.s32.totalorder %v380_v33, %v381_v35  ;;  %vm391_vm11 = vcmp.lt.s32.totalorder %v389_v34, %v390_v36 }
 0x289   : > { %v383_v37 = vsel %vm382_vm10, %v380_v33, %v381_v35  ;;  %v392_v38 = vsel %vm391_vm11, %v389_v34, %v390_v36 }
 0x28a   : > { %v384_v39 = vrot.slane %v383_v37, 1  ;;  %v393_v40 = vrot.slane %v392_v38, 1 }
 0x28c   : > { %vm385_vm12 = vcmp.lt.s32.totalorder %v383_v37, %v384_v39  ;;  %vm394_vm13 = vcmp.lt.s32.totalorder %v392_v38, %v393_v40 }
 0x28d   : > { %v386_v41 = vsel %vm385_vm12, %v383_v37, %v384_v39  ;;  %v395_v42 = vsel %vm394_vm13, %v392_v38, %v393_v40 }
 0x28e   : > { %vm398_vm14 = vcmp.eq.s32.totalorder %v961_v30, %v386_v41  ;;  %vm399_vm15 = vcmp.eq.s32.totalorder %v961_v30, %v395_v42 }
 0x28f   : > { %v400_v43 = vsel %vm398_vm14, -inf, %v360_v11  ;;  %v401_v44 = vsel %vm399_vm15, -inf, %v361_v12 }
 0x290   : > { %v402_v45 = vrot.slane %v400_v43, 4  ;;  %v408_v46 = vrot.slane %v401_v44, 4 }
 0x292   : > { %v403_v47 = vmax.f32 %v400_v43, %v402_v45  ;;  %v409_v48 = vmax.f32 %v401_v44, %v408_v46 }
 0x294   : > { %v404_v49 = vrot.slane %v403_v47, 2  ;;  %v410_v50 = vrot.slane %v409_v48, 2 }
 0x296   : > { %v405_v53 = vmax.f32 %v403_v47, %v404_v49  ;;  %v411_v54 = vmax.f32 %v409_v48, %v410_v50 }
 0x298   : > { %v406_v57 = vrot.slane %v405_v53, 1  ;;  %v412_v58 = vrot.slane %v411_v54, 1 }
 0x29a   : > { %v407_v0 = vmax.f32 %v405_v53, %v406_v57  ;;  %v413_v1 = vmax.f32 %v411_v54, %v412_v58 }
 0x29c   : > { %v414_v2 = vadd.f32 %v407_v0, %v396_v62  ;;  %v415_v3 = vadd.f32 %v413_v1, %v397_v63 }
 0x29e   : > { %v416_v4 = vmul.f32 0.25, %v414_v2  ;;  %v417_v5 = vmul.f32 0.25, %v415_v3 }
 0x2a0   : > { %v420_v59 = vcombine.low %v416_v4, %v417_v5 }
 0x2a2   : > { %v427_v32 = vrot.slane %v420_v59, %v426_v31 }
 0x2a4   : > { %v434_v60 = vrot.slane %v427_v32, %v426_v31 }
 0x2a6   : > { %440 = vst.msk [vmem:[%s955_s7] sm:$0x3] %vm438_vm0, %v434_v60 }
 0x2a7   : > { %726 = shalt.err (!%p723_p12)
}
 0x2a8   : > { %s727_s8 = scalar_lea.hbm %s454_s27, 32  ;;  %s731_s17 = scalar_lea.hbm %s1032_s2, 64 }
 0x2a9   : > { %p728_p5 = scmp.ne.s32.totalorder %s454_s27, %s727_s8  ;;  %p732_p6 = scmp.lt.s32.totalorder %s454_s27, %s1032_s2 }
 0x2aa   : > { %p733_p4 = scmp.lt.s32.totalorder %s731_s17, %s727_s8 }
 0x2ab   : > { %p729_p7 = pnand %p728_p5, %p1049_p11 }
 0x2ac   : > { %p734_p8 = por %p733_p4, %p732_p6 }
 0x2ad   : > { %p730_p10 = pneg %p729_p7 }
 0x2af   : > { %p735_p9 = pnand %p734_p8, %p730_p10 }
 0x2b1   : > { %738 = shalt.err (!%p735_p9)
}
 0x2b2   : > { %583 = dma.vmem_to_hbm [thread:$0]  (%p1049_p11), %s457_s24, 32, %s454_s27, %s442_s30  }
 0x2b3 PF: > { %s468_s19 = sand.u32 1, %s777_s9   ;;  %p1050_p13 = scmp.ne.s32.totalorder %s1038_s16, 0 }
 0x2b4   : > { %p1051_p1 = scmp.ge.s32.totalorder %s789_s12, 2  ;;  %s469_s21 = scalar_lea.sflag [#allocation4], %s468_s19 }
 0x2b6   : > { %p594_p2 = pnand %p1051_p1, %p1050_p13 }
 0x2b8   : > { %p595_p0 = pneg %p594_p2 }
 0x2ba   : > { %772 = dma.done.wait (%p595_p0), %s469_s21, 32  }
 0x2bb   : > { %774 = vsyncadd (%p595_p0), %s469_s21, 4294967264  ;;  %p16_p3 = scmp.ge.s32.totalorder %s869_s20, 4   ;;  %s1052_s9 = smov %s781_s10 }
 0x2bc   : > { %s1053_s10 = smov %s785_s11  ;;  %s1054_s11 = smov %s896_s28 }
 0x2bd   : > { %s1055_s12 = smov %s869_s20  ;;  %18 = sbr.rel (!%p16_p3) target bundleno = 6 (0x6), region = 97 }
 0x2c2   :  { %474 = vsyncpa [#allocation3], 1 }
 0x2c3   :  { %476 = vsyncpa [#allocation3 + $0x1], 1 }
 0x2c4   :  { %477 = vsyncpa [#allocation6], 1 }
 0x2c5   :  { %479 = vsyncpa [#allocation6 + $0x1], 1 }
 0x2c6   :  { %480 = vsyncpa [#allocation4], 1 }
 0x2c7   :  { %482 = vsyncpa [#allocation4 + $0x1], 1 }

</bundles_post_ra>
